<compile_context>
chip_gen: v6e
topology: v6e:2x2x1
jax: 0.10.0
libtpu: 0.0.40
codegen_flags: <defaults>
</compile_context>

<pallas_src>
import functools

import jax
import jax.numpy as jnp
from jax.experimental import pallas as pl
from jax.experimental.pallas import tpu as pltpu


def _ln_channel_first_kernel(x_ref, wb_ref, o_ref, *, eps, inv_c):
    # x_ref: (1, C, T) spatial tile; the channel axis (sublanes) is whole, so
    # the reduction is exact regardless of how HW is tiled.
    x = x_ref[...].astype(jnp.float32)

    # One-pass statistics: read x once, biased variance = E[x^2] - mean^2.
    s1 = jnp.sum(x, axis=1, keepdims=True)           # (1, 1, T)
    s2 = jnp.sum(x * x, axis=1, keepdims=True)       # (1, 1, T)
    mean = s1 * inv_c
    var = jnp.maximum(s2 * inv_c - mean * mean, 0.0)
    denom = jnp.sqrt(var) + eps                      # (x - mean) / (std + eps)

    # EUP approximate reciprocal on the (1, 1, T) stats row (separate VLIW
    # slot), plus one Newton-Raphson step to recover full f32 accuracy.
    inv = pl.reciprocal(denom, approx=True)
    inv = inv * (2.0 - denom * inv)

    wb = wb_ref[...].astype(jnp.float32)             # (2, C, 1): [weight; bias]
    w = wb[0:1]                                      # (1, C, 1)
    b = wb[1:2]                                      # (1, C, 1)

    o_ref[...] = ((x - mean) * inv * w + b).astype(o_ref.dtype)


def _pick_spatial_tile(hw, c, itemsize, budget_bytes=8 << 20):
    """Largest lane tile s.t. double-buffered in+out native-dtype blocks plus
    fp32 temporaries stay comfortably inside the smallest default scoped VMEM
    (16 MiB on v5e, 32 MiB on v6e/v7x)."""
    per_lane_bytes = max(1, c * itemsize)
    max_t = max(128, (budget_bytes // 8) // per_lane_bytes)
    if hw <= max_t:
        return hw                              # full extent: always a legal block dim
    return max(128, (max_t // 128) * 128)      # lane-dense, multiple-of-128 tiles


def layer_norm_channel_first(x, weight, bias, eps=1e-6):
    """x: (N, C, H, W); weight, bias: (C,). Returns (N, C, H, W)."""
    N, C, H, W = x.shape
    HW = H * W
    itemsize = jnp.dtype(x.dtype).itemsize

    x_flat = x.reshape(N, C, HW)
    # Pack weight+bias into a single tiny operand -> one parameter DMA.
    wb = jnp.stack([weight, bias], axis=0).reshape(2, C, 1)

    T = _pick_spatial_tile(HW, C, itemsize)
    num_t = pl.cdiv(HW, T)
    # TODO(synk): for very small C (e.g. C=4), folding a few batch images into
    # the sublane axis would fill vregs better; kept simple here.

    kernel = functools.partial(_ln_channel_first_kernel, eps=eps, inv_c=1.0 / C)

    cost = pl.CostEstimate(
        flops=8 * N * C * HW,
        transcendentals=2 * N * HW,
        bytes_accessed=2 * N * C * HW * itemsize
        + 2 * C * jnp.dtype(weight.dtype).itemsize,
    )

    out = pl.pallas_call(
        kernel,
        out_shape=jax.ShapeDtypeStruct((N, C, HW), x.dtype),
        grid_spec=pltpu.PrefetchScalarGridSpec(
            num_scalar_prefetch=0,
            grid=(N, num_t),
            in_specs=[
                pl.BlockSpec((1, C, T), lambda n, t: (n, 0, t)),
                pl.BlockSpec((2, C, 1), lambda n, t: (0, 0, 0)),
            ],
            out_specs=pl.BlockSpec((1, C, T), lambda n, t: (n, 0, t)),
        ),
        compiler_params=pltpu.CompilerParams(
            dimension_semantics=("parallel", "parallel")),
        cost_estimate=cost,
    )(x_flat, wb)
    return out.reshape(N, C, H, W)


if __name__ == "__main__":
    key = jax.random.PRNGKey(0)
    N, C, H, W = 2, 4, 16, 16
    x = jax.random.normal(key, (N, C, H, W), dtype=jnp.float32)

    # Deterministic parameter init matching nn.Parameter(torch.ones/zeros(C)).
    weight = jnp.ones((C,), dtype=jnp.float32)
    bias = jnp.zeros((C,), dtype=jnp.float32)

    out = layer_norm_channel_first(x, weight, bias, eps=1e-6)
    out = jax.block_until_ready(out)

    # Pure-JAX reference with the same semantics as the PyTorch module:
    # (x - mean) / (sqrt(biased var) + eps) * w + b.
    mean = jnp.mean(x, axis=1, keepdims=True)
    std = jnp.sqrt(jnp.mean((x - mean) ** 2, axis=1, keepdims=True))
    ref = (x - mean) / (std + 1e-6)
    ref = ref * weight[None, :, None, None] + bias[None, :, None, None]
    assert jnp.allclose(out, ref, atol=1e-4, rtol=1e-4), (
        float(jnp.max(jnp.abs(out - ref))))

    print("KERNEL_OK")
</pallas_src>

<mosaic_0001>
module attributes {stable_mosaic.version = 11 : i64} {
  func.func @_ln_channel_first_kernel(%arg0: i32, %arg1: i32, %arg2: memref<1x4x256xf32, #tpu.memory_space<vmem>>, %arg3: memref<2x4x1xf32, #tpu.memory_space<vmem>>, %arg4: memref<1x4x256xf32, #tpu.memory_space<vmem>>) attributes {dimension_semantics = [#tpu.dimension_semantics<parallel>, #tpu.dimension_semantics<parallel>], iteration_bounds = array<i64: 2, 1>, scalar_prefetch = 0 : i64, scratch_operands = 0 : i64, tpu.core_type = #tpu.core_type<tc>, window_params = [{transform_indices = @transform_0, window_bounds = array<i64: 1, 4, 256>}, {pipeline_mode = #tpu.pipeline_mode<synchronous>, transform_indices = @transform_1, window_bounds = array<i64: 2, 4, 1>}, {transform_indices = @transform_2, window_bounds = array<i64: 1, 4, 256>}]} {
    %c0 = arith.constant 0 : index
    %c0_0 = arith.constant 0 : index
    %c0_1 = arith.constant 0 : index
    %0 = vector.load %arg2[%c0, %c0_0, %c0_1] : memref<1x4x256xf32, #tpu.memory_space<vmem>>, vector<1x4x256xf32>
    %cst = arith.constant dense<0.000000e+00> : vector<1x256xf32>
    %1 = vector.multi_reduction <add>, %0, %cst [1] : vector<1x4x256xf32> to vector<1x256xf32>
    %2 = vector.shape_cast %1 : vector<1x256xf32> to vector<1x1x256xf32>
    %3 = arith.mulf %0, %0 : vector<1x4x256xf32>
    %cst_2 = arith.constant dense<0.000000e+00> : vector<1x256xf32>
    %4 = vector.multi_reduction <add>, %3, %cst_2 [1] : vector<1x4x256xf32> to vector<1x256xf32>
    %5 = vector.shape_cast %4 : vector<1x256xf32> to vector<1x1x256xf32>
    %cst_3 = arith.constant 2.500000e-01 : f32
    %6 = vector.broadcast %cst_3 : f32 to vector<1x1x256xf32>
    %7 = arith.mulf %2, %6 : vector<1x1x256xf32>
    %cst_4 = arith.constant 2.500000e-01 : f32
    %8 = vector.broadcast %cst_4 : f32 to vector<1x1x256xf32>
    %9 = arith.mulf %5, %8 : vector<1x1x256xf32>
    %10 = arith.mulf %7, %7 : vector<1x1x256xf32>
    %11 = arith.subf %9, %10 : vector<1x1x256xf32>
    %cst_5 = arith.constant 0.000000e+00 : f32
    %12 = vector.broadcast %cst_5 : f32 to vector<1x1x256xf32>
    %13 = arith.maximumf %11, %12 : vector<1x1x256xf32>
    %14 = math.sqrt %13 : vector<1x1x256xf32>
    %cst_6 = arith.constant 9.99999997E-7 : f32
    %15 = vector.broadcast %cst_6 : f32 to vector<1x1x256xf32>
    %16 = arith.addf %14, %15 : vector<1x1x256xf32>
    %17 = tpu.reciprocal %16 {approx = true} : vector<1x1x256xf32> -> vector<1x1x256xf32>
    %18 = arith.mulf %16, %17 : vector<1x1x256xf32>
    %cst_7 = arith.constant 2.000000e+00 : f32
    %19 = vector.broadcast %cst_7 : f32 to vector<1x1x256xf32>
    %20 = arith.subf %19, %18 : vector<1x1x256xf32>
    %21 = arith.mulf %17, %20 : vector<1x1x256xf32>
    %c0_8 = arith.constant 0 : index
    %c0_9 = arith.constant 0 : index
    %c0_10 = arith.constant 0 : index
    %22 = vector.load %arg3[%c0_8, %c0_9, %c0_10] : memref<2x4x1xf32, #tpu.memory_space<vmem>>, vector<2x4x1xf32>
    %23 = vector.extract_strided_slice %22 {offsets = [0, 0, 0], sizes = [1, 4, 1], strides = [1, 1, 1]} : vector<2x4x1xf32> to vector<1x4x1xf32>
    %24 = vector.extract_strided_slice %22 {offsets = [1, 0, 0], sizes = [1, 4, 1], strides = [1, 1, 1]} : vector<2x4x1xf32> to vector<1x4x1xf32>
    %25 = vector.broadcast %7 : vector<1x1x256xf32> to vector<1x4x256xf32>
    %26 = arith.subf %0, %25 : vector<1x4x256xf32>
    %27 = vector.broadcast %21 : vector<1x1x256xf32> to vector<1x4x256xf32>
    %28 = arith.mulf %26, %27 : vector<1x4x256xf32>
    %29 = vector.broadcast %23 : vector<1x4x1xf32> to vector<1x4x256xf32>
    %30 = arith.mulf %28, %29 : vector<1x4x256xf32>
    %31 = vector.broadcast %24 : vector<1x4x1xf32> to vector<1x4x256xf32>
    %32 = arith.addf %30, %31 : vector<1x4x256xf32>
    %c0_11 = arith.constant 0 : index
    %c0_12 = arith.constant 0 : index
    %c0_13 = arith.constant 0 : index
    %33 = vector.load %arg4[%c0_11, %c0_12, %c0_13] : memref<1x4x256xf32, #tpu.memory_space<vmem>>, vector<1x4x256xf32>
    tpu.vector_store %arg4[%c0_11, %c0_12, %c0_13], %32 {strides = array<i32>} : memref<1x4x256xf32, #tpu.memory_space<vmem>>, vector<1x4x256xf32>,
    return
  }
  func.func @transform_0(%arg0: i32, %arg1: i32) -> (i32, i32, i32) {
    %c0_i32 = arith.constant 0 : i32
    %c0_i32_0 = arith.constant 0 : i32
    return %arg0, %c0_i32, %arg1 : i32, i32, i32
  }
  func.func @transform_1(%arg0: i32, %arg1: i32) -> (i32, i32, i32) {
    %c0_i32 = arith.constant 0 : i32
    %c0_i32_0 = arith.constant 0 : i32
    %c0_i32_1 = arith.constant 0 : i32
    %c0_i32_2 = arith.constant 0 : i32
    return %c0_i32, %c0_i32_0, %c0_i32_1 : i32, i32, i32
  }
  func.func @transform_2(%arg0: i32, %arg1: i32) -> (i32, i32, i32) {
    %c0_i32 = arith.constant 0 : i32
    %c0_i32_0 = arith.constant 0 : i32
    return %arg0, %c0_i32, %arg1 : i32, i32, i32
  }
}

</mosaic_0001>

<bundles_post_ra>
// kernel: tpu_custom_call.1
= control target key start
LH: loop header
LB: loop body
LE: loop exit
PB: predicated region body
PF: predicated region fallthrough
CT: control target
= control target key end

     0   :  { %7 = vsyncpa [#allocation3], 0  ;;  %s763_s0 = inlined_call_operand.hbm [shape: f32[2,4,256], index: 0, kind: input, shape index: {}]   ;;  %s764_s1 = inlined_call_operand.vmem [shape: f32[2,4,1], index: 1, kind: input, shape index: {}]   ;;  %s765_s2 = inlined_call_operand.hbm [shape: f32[2,4,256], index: 2, kind: output, shape index: {}]  }
   0x1   :  { %9 = vsyncpa [#allocation3 + $0x1], 0 }
   0x2   :  { %10 = vsyncpa [#allocation4], 0 }
   0x3   :  { %12 = vsyncpa [#allocation4 + $0x1], 0  ;;  %s611_s9 = smov 0   ;;  %s613_s10 = smov 0  }
   0x4   :  { %s615_s11 = smov 0   ;;  %s617_s12 = smov 0  }
   0x5   :  { %s619_s13 = smov 0   ;;  %s621_s14 = smov 0  }
   0x6 LB: > { %s391_s15 = sadd.s32 4294967295, %s590_s14   ;;  %s392_s16 = sadd.s32 4294967294, %s590_s14   ;;  %s590_s14 = sphi %s621_s14, %s18_s14   ;;  %s586_s13 = sphi %s619_s13, %s777_s13   ;;  %s582_s12 = sphi %s617_s12, %s776_s12   ;;  %s578_s11 = sphi %s615_s11, %s775_s11   ;;  %s574_s10 = sphi %s613_s10, %s774_s10   ;;  %s570_s9 = sphi %s611_s9, %s773_s9  }
   0x7   : > { %s30_s17 = sadd.s32 1, %s586_s13  ;;  %s39_s18 = sadd.s32 1, %s578_s11 }
   0x8   : > { %p32_p0 = scmp.ge.s32.totalorder %s30_s17, 2  ;;  %p46_p1 = scmp.ne.s32.totalorder %s578_s11, %s574_s10 }
   0x9   : > { %p47_p2 = scmp.eq.s32.totalorder %s590_s14, 0  ;;  %p52_p3 = scmp.ne.s32.totalorder %s574_s10, %s570_s9 }
   0xa   : > { %s779_s17 = smov (%p32_p0, %s30_s17), 0  ;;  %p53_p5 = scmp.eq.s32.totalorder %s391_s15, 0 }
   0xb   : > { %p652_p4 = por %p47_p2, %p46_p1  ;;  %s34_s20 = ssub.s32 %s586_s13, %s779_s17 }
   0xc   : > { %p99_p6 = scmp.eq.s32.totalorder %s391_s15, 1  ;;  %p37_p7 = scmp.eq.s32.totalorder %s34_s20, 0 }
   0xd   : > { %p658_p8 = por %p53_p5, %p52_p3  ;;  %p105_p10 = scmp.eq.s32.totalorder %s392_s16, 1 }
   0xe   : > { %p662_p9 = por %p99_p6, %p46_p1  ;;  %p420_p13 = scmp.lt.s32.totalorder %s590_s14, 2 }
   0xf   : > { %s667_s23 = scalar_select %p37_p7, %s578_s11, %s39_s18  }
  0x10   : > { %p669_p11 = por %p105_p10, %p52_p3  ;;  %s128_s25 = sand.u32 1, %s578_s11  }
  0x11   : > { %s395_s26 = sshll.u32 %s128_s25, 3  ;;  %s406_s27 = sshll.u32 %s586_s13, 7 }
  0x12   : > { %s769_s24 = scalar_select %p669_p11, 1, 0 }
  0x13   : > { %s140_s30 = scalar_lea.hbm %s763_s0, %s406_s27  ;;  %s132_s3 = scalar_lea.vmem [#allocation2], %s395_s26 }
  0x14   : > { %s142_s4 = sshll.u32 %s132_s3, 4  ;;  %p682_p0 = pnand %p420_p13, %p652_p4  ;;  %s143_s4 = int_to_ptr.vmem [resolvable:$true] %s142_s4 }
  0x15   : > { %p398_p1 = scmp.ge.s32.totalorder %s590_s14, 1  ;;  %p147_p2 = scmp.lt.s32.totalorder %s590_s14, 3 }
  0x16   : > { %s129_s6 = scalar_lea.sflag [#allocation3], %s128_s25  ;;  %p484_p3 = pneg %p682_p0 }
  0x17   : > { %s495_s7 = scalar_lea.vmem %s143_s4, 128  ;;  %s592_s8 = smov [#allocation2]  }
  0x18   : > { %p496_p5 = scmp.ne.s32.totalorder %s143_s4, %s495_s7  ;;  %s500_s15 = sshll.u32 %s592_s8, 4  ;;  %s501_s15 = int_to_ptr.vmem [resolvable:$false] %s500_s15 }
  0x19   : > { %s502_s16 = scalar_lea.vmem %s501_s15, 256  ;;  %p503_p10 = scmp.lt.s32.totalorder %s143_s4, %s501_s15 }
  0x1a   : > { %p498_p6 = pnand %p496_p5, %p484_p3  ;;  %p504_p12 = scmp.lt.s32.totalorder %s502_s16, %s495_s7 }
  0x1c   : > { %p499_p7 = pneg %p498_p6  ;;  %p505_p4 = por %p504_p12, %p503_p10 }
  0x1e   : > { %p506_p13 = pnand %p505_p4, %p499_p7 }
  0x20   : > { %509 = shalt.err (!%p506_p13)
}
  0x21   : > { %415 = dma.hbm_to_vmem [thread:$0]  (!%p682_p0), %s140_s30, 128, %s143_s4, %s129_s6  }
  0x22   : > { %p148_p11 = pnand %p398_p1, %p147_p2 }
  0x23   : > { %s697_s18 = sand.u32 (!%p148_p11), 1, %s574_s10  }
  0x24   : > { %151 = sbr.rel (%p148_p11) target bundleno = 189 (0xbd), region = 28  ;;  %s399_s19 = sshll.u32 (!%p148_p11), %s697_s18, 3 }
  0x25   : > { %s154_s20 = scalar_lea.sflag (!%p148_p11), [#allocation3], %s697_s18  ;;  %s157_s25 = scalar_lea.vmem (!%p148_p11), [#allocation2], %s399_s19 }
  0x29   : > { %561 = dma.done.wait (%p658_p8), %s154_s20, 128  }
  0x2a   : > { %563 = vsyncadd (%p658_p8), %s154_s20, 4294967168  ;;  %v593_v0 = vmov 0   ;;  %v251_v1 = vld [vmem:[%s764_s1] sm:$0xf]  ;;  %v252_v2 = vld [vmem:[%s764_s1 + $0x4] sm:$0xf]  ;;  %v270_v61 = vlaneseq }
  0x2b   : > { %472 = vset.pattern.permute.xlu0 %v593_v0  ;;  %v713_v3 = vld [vmem:[%s157_s25] sm:$0xff]  ;;  %vm184_vm0 = vcmask 1043456   ;;  %v594_v62 = vmov 839922192   ;;  %s407_s21 = sshll.u32 %s582_s12, 7  ;;  %s177_s30 = scalar_lea.vmem [#allocation5], %s399_s19 }
  0x2c   : > { %265 = vperm.xlu0 %472, %v251_v1   ;;  %v182_v4 = vcombine.high %v713_v3, %v713_v3  ;;  %v199_v5 = vmul.f32 %v713_v3, %v713_v3  ;;  %v185_v6 = vsel %vm184_vm0, %v713_v3, 0.0  ;;  %v268_v63 = vunpack.c.l.s4 %v594_v62  ;;  %s307_s3 = sshll.u32 %s177_s30, 4  ;;  %s305_s6 = scalar_lea.hbm %s765_s2, %s407_s21  ;;  %s308_s3 = int_to_ptr.vmem [resolvable:$true] %s307_s3 }
  0x2d   : > { %v186_v9 = vrot.slane %v185_v6, 4  ;;  %s291_s7 = scalar_lea.sflag [#allocation4], %s697_s18  ;;  %s510_s8 = scalar_lea.vmem %s308_s3, 128 }
  0x2e   : > { %v192_v7 = vsel %vm184_vm0, %v182_v4, 0.0  ;;  %v201_v8 = vcombine.high %v199_v5, %v199_v5  ;;  %v203_v11 = vsel %vm184_vm0, %v199_v5, 0.0  ;;  %v269_v4 = vunpack.c.0.s8 %v268_v63  ;;  %p511_p8 = scmp.ne.s32.totalorder %s308_s3, %s510_s8  ;;  %s595_s15 = smov [#allocation5]  }
  0x2f   : > { %v193_v10 = vrot.slane %v192_v7, 4  ;;  %v187_v13 = vadd.f32 %v186_v9, %v185_v6  ;;  %v204_v14 = vrot.slane %v203_v11, 4  ;;  %s514_s12 = sshll.u32 %s595_s15, 4  ;;  %s515_s12 = int_to_ptr.vmem [resolvable:$false] %s514_s12 }
  0x30   : > { %278 = vperm.xlu0 %472, %v252_v2   ;;  %v210_v12 = vsel %vm184_vm0, %v201_v8, 0.0  ;;  %v271_v2 = vshrl.u32 %v270_v61, 7  ;;  %p512_p11 = pnand %p511_p8, %p662_p9  ;;  %s516_s16 = scalar_lea.vmem %s515_s12, 256 }
  0x31   : > { %v194_v15 = vadd.f32 %v193_v10, %v192_v7  ;;  %v211_v16 = vrot.slane %v210_v12, 4  ;;  %v188_v17 = vrot.slane %v187_v13, 2  ;;  %v205_v18 = vadd.f32 %v204_v14, %v203_v11  ;;  %p517_p0 = scmp.lt.s32.totalorder %s308_s3, %s515_s12  ;;  %p518_p1 = scmp.lt.s32.totalorder %s516_s16, %s510_s8 }
  0x32   : > { %v272_v8 = vsub.s32 %v269_v4, %v271_v2  ;;  %p513_p12 = pneg %p512_p11 }
  0x33   : > { %v195_v19 = vrot.slane %v194_v15, 2  ;;  %v212_v20 = vadd.f32 %v211_v16, %v210_v12  ;;  %v189_v21 = vadd.f32 %v188_v17, %v187_v13  ;;  %v206_v22 = vrot.slane %v205_v18, 2  ;;  %p519_p2 = por %p518_p1, %p517_p0 }
  0x35   : > { %v196_v23 = vadd.f32 %v195_v19, %v194_v15  ;;  %v213_v24 = vrot.slane %v212_v20, 2  ;;  %v190_v25 = vrot.slane %v189_v21, 1  ;;  %v207_v26 = vadd.f32 %v206_v22, %v205_v18  ;;  %p520_p3 = pnand %p519_p2, %p513_p12 }
  0x37   : > { %v197_v27 = vrot.slane %v196_v23, 1  ;;  %v214_v28 = vadd.f32 %v213_v24, %v212_v20  ;;  %v191_v29 = vadd.f32 %v190_v25, %v189_v21  ;;  %v208_v30 = vrot.slane %v207_v26, 1 }
  0x39   : > { %v198_v31 = vadd.f32 %v197_v27, %v196_v23  ;;  %v215_v32 = vrot.slane %v214_v28, 1  ;;  %v209_v33 = vadd.f32 %v208_v30, %v207_v26  ;;  %v217_v34 = vmul.f32 0.25, %v191_v29 }
  0x3b   : > { %v216_v35 = vadd.f32 %v215_v32, %v214_v28  ;;  %v218_v36 = vmul.f32 0.25, %v198_v31  ;;  %v219_v37 = vmul.f32 0.25, %v209_v33  ;;  %v221_v38 = vmul.f32 %v217_v34, %v217_v34 }
  0x3d   : > { %v220_v39 = vmul.f32 0.25, %v216_v35  ;;  %v222_v40 = vmul.f32 %v218_v36, %v218_v36  ;;  %v223_v41 = vsub.f32 %v219_v37, %v221_v38  ;;  %v255_v7 = vcombine.low %v217_v34, %v218_v36 }
  0x3f   : > { %v224_v42 = vsub.f32 %v220_v39, %v222_v40  ;;  %v225_v43 = vmax.f32 %v223_v41, 0.0  ;;  %v257_v9 = vsub.f32 %v713_v3, %v255_v7 }
  0x41   : > { %v226_v44 = vmax.f32 %v224_v42, 0.0  ;;  %474 = vrsqrt.f32 %v225_v43  ;;  %vm229_vm1 = vcmp.eq.f32.partialorder %v225_v43, inf  ;;  %v232_v49 = vand.u32 2147483648, %v225_v43 }
  0x42   : > { %vm231_vm3 = vcmp.eq.f32.partialorder %v225_v43, 0.0 }
  0x43   : > { %476 = vrsqrt.f32 %v226_v44  ;;  %vm236_vm2 = vcmp.eq.f32.partialorder %v226_v44, inf  ;;  %v239_v51 = vand.u32 2147483648, %v226_v44  ;;  %vm238_vm4 = vcmp.eq.f32.partialorder %v226_v44, 0.0 }
  0x4e   : > { %v475_v45 = vpop.eup %474 }
  0x4f   : > { %v228_v47 = vmul.f32 %v475_v45, %v225_v43 }
  0x50   : > { %v477_v46 = vpop.eup %476 }
  0x51   : > { %v235_v48 = vmul.f32 %v477_v46, %v226_v44  ;;  %v230_v50 = vsel %vm229_vm1, %v225_v43, %v228_v47 }
  0x52   : > { %v233_v53 = vsel %vm231_vm3, %v232_v49, %v230_v50 }
  0x53   : > { %v237_v52 = vsel %vm236_vm2, %v226_v44, %v235_v48  ;;  %v241_v55 = vadd.f32 1e-06, %v233_v53 }
  0x54   : > { %v240_v54 = vsel %vm238_vm4, %v239_v51, %v237_v52 }
  0x55   : > { %v242_v56 = vadd.f32 1e-06, %v240_v54  ;;  %478 = vrcp.f32 %v241_v55 }
  0x57   : > { %480 = vrcp.f32 %v242_v56 }
  0x62   : > { %v479_v57 = vpop.eup %478 }
  0x63   : > { %v245_v59 = vmul.f32 %v479_v57, %v241_v55 }
  0x64   : > { %v481_v58 = vpop.eup %480 }
  0x65   : > { %v246_v60 = vmul.f32 %v481_v58, %v242_v56  ;;  %v247_v0 = vsub.f32 2.0, %v245_v59 }
  0x67   : > { %v248_v1 = vsub.f32 2.0, %v246_v60  ;;  %v249_v5 = vmul.f32 %v479_v57, %v247_v0 }
  0x69   : > { %v250_v6 = vmul.f32 %v481_v58, %v248_v1 }
  0x6b   : > { %v260_v10 = vcombine.low %v249_v5, %v250_v6 }
  0x6d   : > { %v262_v12 = vmul.f32 %v260_v10, %v257_v9 }
  0xa7   : > { %v266_v11 = vpop.permute.xlu0 %265 }
  0xa8   : > { %v273_v13 = vrot.slane %v266_v11, %v272_v8 }
  0xaa   : > { %v275_v15 = vmul.f32 %v273_v13, %v262_v12 }
  0xab   : > { %v279_v14 = vpop.permute.xlu0 %278 }
  0xac   : > { %v286_v16 = vrot.slane %v279_v14, %v272_v8 }
  0xae   : > { %v288_v17 = vadd.f32 %v286_v16, %v275_v15 }
  0xb0   : > { %289 = vst [vmem:[%s177_s30] sm:$0xff] %v288_v17 }
  0xb1   : > { %523 = shalt.err (!%p520_p3)
}
  0xb2   : > { %s524_s19 = scalar_lea.hbm %s305_s6, 128  ;;  %s528_s25 = scalar_lea.hbm %s765_s2, 256 }
  0xb3   : > { %p525_p5 = scmp.ne.s32.totalorder %s305_s6, %s524_s19  ;;  %p529_p10 = scmp.lt.s32.totalorder %s305_s6, %s765_s2 }
  0xb4   : > { %p530_p4 = scmp.lt.s32.totalorder %s528_s25, %s524_s19 }
  0xb5   : > { %p526_p6 = pnand %p525_p5, %p662_p9 }
  0xb6   : > { %p531_p13 = por %p530_p4, %p529_p10 }
  0xb7   : > { %p527_p7 = pneg %p526_p6 }
  0xb9   : > { %p532_p8 = pnand %p531_p13, %p527_p7 }
  0xbb   : > { %535 = shalt.err (!%p532_p8)
}
  0xbc   : > { %410 = dma.vmem_to_hbm [thread:$0]  (%p662_p9), %s308_s3, 128, %s305_s6, %s291_s7  }
  0xbd PF: > { %s319_s28 = sand.u32 1, %s570_s9   ;;  %p771_p11 = scmp.ne.s32.totalorder %s769_s24, 0 }
  0xbe   : > { %p772_p12 = scmp.ge.s32.totalorder %s590_s14, 2  ;;  %s320_s29 = scalar_lea.sflag [#allocation4], %s319_s28 }
  0xc0   : > { %p417_p0 = pnand %p772_p12, %p771_p11 }
  0xc2   : > { %p418_p1 = pneg %p417_p0 }
  0xc4   : > { %565 = dma.done.wait (%p418_p1), %s320_s29, 128  }
  0xc5   : > { %567 = vsyncadd (%p418_p1), %s320_s29, 4294967168  ;;  %s18_s14 = sadd.s32 1, %s590_s14   ;;  %s773_s9 = smov %s574_s10 }
  0xc6   : > { %p15_p2 = scmp.ge.s32.totalorder %s18_s14, 4   ;;  %s774_s10 = smov %s578_s11 }
  0xc7   : > { %s775_s11 = smov %s667_s23  ;;  %s776_s12 = smov %s586_s13 }
  0xc8   : > { %s777_s13 = smov %s779_s17  ;;  %17 = sbr.rel (!%p15_p2) target bundleno = 6 (0x6), region = 73 }
  0xcd   :  { %325 = vsyncpa [#allocation3], 1 }
  0xce   :  { %327 = vsyncpa [#allocation3 + $0x1], 1 }
  0xcf   :  { %328 = vsyncpa [#allocation4], 1 }
  0xd0   :  { %330 = vsyncpa [#allocation4 + $0x1], 1 }

</bundles_post_ra>
